<compile_context>
chip_gen: v7x
topology: tpu7x:2x2x1
jax: 0.10.0
libtpu: 0.0.40
codegen_flags: <defaults>
</compile_context>

<pallas_src>
import jax
import jax.numpy as jnp
from jax.experimental import pallas as pl
from jax.experimental.pallas import tpu as pltpu


_MIB = 1024 * 1024
# Conservative cross-generation budget for all live VMEM tiles:
# v7x has 64 MiB physical VMEM per TensorCore, v5e/v6e have 128 MiB.
_VMEM_BUDGET = 44 * _MIB


def _round_up(v, m):
    return (v + m - 1) // m * m


def _linear_kernel_resident(x_ref, w_ref, b_ref, o_ref):
    """Hot path: full-K reduction, weight resident in VMEM.

    x_ref: (TM, K) input tile, w_ref: (K, E) compute-dtype resident weight,
    b_ref: (1, E) f32 bias, o_ref: (TM, E) output tile.
    """
    x = x_ref[...].astype(w_ref.dtype)
    acc = jnp.dot(x, w_ref[...], preferred_element_type=jnp.float32)
    o_ref[...] = (acc + b_ref[...]).astype(o_ref.dtype)


def _linear_kernel_ksplit(x_ref, w_ref, b_ref, o_ref, acc_ref):
    """Fallback for very large K: K-tiled reduction with f32 accumulator."""
    k = pl.program_id(1)

    @pl.when(k == 0)
    def _():
        acc_ref[...] = jnp.zeros_like(acc_ref)

    x = x_ref[...].astype(w_ref.dtype)
    acc_ref[...] += jnp.dot(x, w_ref[...], preferred_element_type=jnp.float32)

    @pl.when(k == pl.num_programs(1) - 1)
    def _():
        # Partial (TM, E) output blocks when M % TM != 0 are clipped by Pallas
        # on store, so padded rows never land in HBM.
        o_ref[...] = (acc_ref[...] + b_ref[...]).astype(o_ref.dtype)


def feature_network_forward(x, weight, bias, compute_dtype=jnp.bfloat16):
    """x: (B, C, H, W); weight: (embed_dim, in_ch) torch layout; bias: (embed_dim,).

    compute_dtype: dtype fed to the MXU (default bf16 with f32 accumulation;
    pass jnp.float32 to avoid the documented bf16 downcast of f32 inputs).
    """
    B, C, H, W = x.shape
    K = H * W
    E, K_w = weight.shape
    assert K_w == K, "FeatureNetwork requires H*W == in_channels"

    M = B * C
    x2d = x.reshape(M, K)                       # glue reshape (plain JAX)
    # One-time wrapper prep (amortized over the whole GEMM):
    #   weight -> (K, E) compute_dtype, bias -> (1, E) f32 for the epilogue.
    w_t = weight.T.astype(compute_dtype)
    b2d = bias.reshape(1, E).astype(jnp.float32)

    out_dtype = x.dtype
    x_bytes = x2d.dtype.itemsize
    w_bytes = jnp.dtype(compute_dtype).itemsize
    out_bytes = jnp.dtype(out_dtype).itemsize
    # bf16 packs two rows per sublane -> keep TM a multiple of 16 then.
    sub = 16 if min(x_bytes, out_bytes) < 4 else 8

    # ------------------------------------------------------------------ #
    # Path 1 (hot): single reduction step, weight resident in VMEM.      #
    # ------------------------------------------------------------------ #
    def resident_need(tm):
        return (2 * tm * K * x_bytes        # x tile, double-buffered
                + 2 * K * E * w_bytes       # weight (2 bufs budgeted; fetched once)
                + 2 * tm * E * out_bytes    # out tile, double-buffered
                + tm * E * 4                # f32 matmul result before the cast
                + 2 * E * 4)                # bias

    tm_resident = None
    if M <= 256 and resident_need(M) <= _VMEM_BUDGET:
        tm_resident = M                      # full extent (always layout-legal)
    else:
        for cand in (512, 256, 128, 64, 32, 16, 8):
            if cand < sub or cand > M:
                continue
            if resident_need(cand) <= _VMEM_BUDGET:
                tm_resident = cand
                break

    if tm_resident is not None:
        TM = tm_resident
        nm = pl.cdiv(M, TM)
        vmem_limit = min(max(resident_need(TM) + 4 * _MIB, 16 * _MIB), 64 * _MIB)
        cost = pl.CostEstimate(
            flops=2 * M * K * E,
            transcendentals=0,
            bytes_accessed=(M * K * x_bytes + K * E * w_bytes
                            + M * E * out_bytes + E * 4))
        out2d = pl.pallas_call(
            _linear_kernel_resident,
            out_shape=jax.ShapeDtypeStruct((M, E), out_dtype),
            grid_spec=pltpu.PrefetchScalarGridSpec(
                num_scalar_prefetch=0,
                grid=(nm,),
                in_specs=[
                    pl.BlockSpec((TM, K), lambda i: (i, 0)),   # x tile
                    # Constant block index -> weight DMA'd once, stays resident
                    # across all M tiles (no per-M-tile HBM re-stream).
                    pl.BlockSpec((K, E), lambda i: (0, 0)),
                    pl.BlockSpec((1, E), lambda i: (0, 0)),    # bias
                ],
                out_specs=pl.BlockSpec((TM, E), lambda i: (i, 0)),
            ),
            compiler_params=pltpu.CompilerParams(
                dimension_semantics=("parallel",),
                vmem_limit_bytes=vmem_limit),
            cost_estimate=cost,
        )(x2d, w_t, b2d)
        return out2d.reshape(B, C, E)

    # ------------------------------------------------------------------ #
    # Path 2 (fallback, very large K): K-tiled reduction.                #
    # Weight is re-streamed once per M tile (ceil(M/TM) * E*K*w_bytes),  #
    # so TM is made as large as the budget allows.                       #
    # ------------------------------------------------------------------ #
    TK = 1024
    K_pad = _round_up(K, TK)
    if K_pad != K:
        # Zero-pad the reduction axis so no partial K tile feeds the
        # accumulator (zeros contribute nothing to the dot product).
        x2d = jnp.pad(x2d, ((0, 0), (0, K_pad - K)))
        w_t = jnp.pad(w_t, ((0, K_pad - K), (0, 0)))

    def ksplit_need(tm):
        return (2 * tm * TK * x_bytes       # x tile, double-buffered
                + 2 * TK * E * w_bytes      # weight tile, double-buffered
                + 2 * tm * E * out_bytes    # out tile, double-buffered
                + tm * E * 4                # f32 accumulator scratch
                + 2 * E * 4)                # bias

    TM = M if M <= sub else sub
    for cand in (1024, 512, 256, 128, 64, 32, 16, 8):
        if cand < sub or cand > M:
            continue
        if ksplit_need(cand) <= _VMEM_BUDGET:
            TM = cand
            break
    nm, nk = pl.cdiv(M, TM), K_pad // TK
    vmem_limit = min(max(ksplit_need(TM) + 4 * _MIB, 16 * _MIB), 64 * _MIB)
    cost = pl.CostEstimate(
        flops=2 * M * K_pad * E,
        transcendentals=0,
        bytes_accessed=(M * K_pad * x_bytes + nm * K_pad * E * w_bytes
                        + M * E * out_bytes + E * 4))
    out2d = pl.pallas_call(
        _linear_kernel_ksplit,
        out_shape=jax.ShapeDtypeStruct((M, E), out_dtype),
        grid_spec=pltpu.PrefetchScalarGridSpec(
            num_scalar_prefetch=0,
            grid=(nm, nk),
            in_specs=[
                pl.BlockSpec((TM, TK), lambda i, k: (i, k)),   # x tile
                pl.BlockSpec((TK, E), lambda i, k: (k, 0)),    # weight tile
                pl.BlockSpec((1, E), lambda i, k: (0, 0)),     # bias
            ],
            out_specs=pl.BlockSpec((TM, E), lambda i, k: (i, 0)),
            scratch_shapes=[pltpu.VMEM((TM, E), jnp.float32)],
        ),
        compiler_params=pltpu.CompilerParams(
            dimension_semantics=("parallel", "arbitrary"),
            vmem_limit_bytes=vmem_limit),
        cost_estimate=cost,
    )(x2d, w_t, b2d)
    return out2d.reshape(B, C, E)


if __name__ == "__main__":
    # Small shapes consistent with the forward: in_channels == H*W.
    B, C, H, W = 2, 4, 16, 16
    in_channels = H * W          # 256
    embed_dim = 128

    key = jax.random.PRNGKey(0)
    kx, kw, kb = jax.random.split(key, 3)

    x = jax.random.normal(kx, (B, C, H, W), dtype=jnp.float32)
    # Deterministic synthetic params (shapes from nn.Linear(in_channels, embed_dim)).
    weight = jax.random.normal(kw, (embed_dim, in_channels), dtype=jnp.float32) * 0.02
    bias = jax.random.normal(kb, (embed_dim,), dtype=jnp.float32) * 0.02

    out = feature_network_forward(x, weight, bias)
    out = jax.block_until_ready(out)

    # Reference check (plain JAX mirror of the PyTorch forward, f32).
    # Kernel runs the MXU in bf16 with f32 accumulation -> loose tolerance.
    ref = x.reshape(B, C, H * W) @ weight.T + bias
    assert out.shape == (B, C, embed_dim)
    assert jnp.allclose(out, ref, atol=2e-2, rtol=2e-2)

    print("KERNEL_OK")
</pallas_src>

<mosaic_0001>
module attributes {stable_mosaic.version = 11 : i64} {
  func.func @_linear_kernel_resident(%arg0: i32, %arg1: memref<8x256xf32, #tpu.memory_space<vmem>>, %arg2: memref<256x128xbf16, #tpu.memory_space<vmem>>, %arg3: memref<1x128xf32, #tpu.memory_space<vmem>>, %arg4: memref<8x128xf32, #tpu.memory_space<vmem>>) attributes {dimension_semantics = [#tpu.dimension_semantics<parallel>], iteration_bounds = array<i64: 1>, scalar_prefetch = 0 : i64, scratch_operands = 0 : i64, tpu.core_type = #tpu.core_type<tc>, window_params = [{transform_indices = @transform_0, window_bounds = array<i64: 8, 256>}, {pipeline_mode = #tpu.pipeline_mode<synchronous>, transform_indices = @transform_1, window_bounds = array<i64: 256, 128>}, {pipeline_mode = #tpu.pipeline_mode<synchronous>, transform_indices = @transform_2, window_bounds = array<i64: 1, 128>}, {transform_indices = @transform_3, window_bounds = array<i64: 8, 128>}]} {
    %c0 = arith.constant 0 : index
    %c0_0 = arith.constant 0 : index
    %0 = vector.load %arg1[%c0, %c0_0] : memref<8x256xf32, #tpu.memory_space<vmem>>, vector<8x256xf32>
    %1 = arith.truncf %0 : vector<8x256xf32> to vector<8x256xbf16>
    %c0_1 = arith.constant 0 : index
    %c0_2 = arith.constant 0 : index
    %2 = vector.load %arg2[%c0_1, %c0_2] : memref<256x128xbf16, #tpu.memory_space<vmem>>, vector<256x128xbf16>
    %cst = arith.constant dense<0.000000e+00> : vector<8x128xf32>
    %3 = tpu.matmul %1, %2, %cst {dimension_numbers = #tpu.dot_dimension_numbers<[1], [0], [0], [1], [0, 0, 1, 1], [], []>} : vector<8x256xbf16>, vector<256x128xbf16>, vector<8x128xf32> -> vector<8x128xf32>
    %c0_3 = arith.constant 0 : index
    %c0_4 = arith.constant 0 : index
    %4 = vector.load %arg3[%c0_3, %c0_4] : memref<1x128xf32, #tpu.memory_space<vmem>>, vector<1x128xf32>
    %5 = vector.broadcast %4 : vector<1x128xf32> to vector<8x128xf32>
    %6 = arith.addf %3, %5 : vector<8x128xf32>
    %c0_5 = arith.constant 0 : index
    %c0_6 = arith.constant 0 : index
    %7 = vector.load %arg4[%c0_5, %c0_6] : memref<8x128xf32, #tpu.memory_space<vmem>>, vector<8x128xf32>
    tpu.vector_store %arg4[%c0_5, %c0_6], %6 {strides = array<i32>} : memref<8x128xf32, #tpu.memory_space<vmem>>, vector<8x128xf32>,
    return
  }
  func.func @transform_0(%arg0: i32) -> (i32, i32) {
    %c0_i32 = arith.constant 0 : i32
    %c0_i32_0 = arith.constant 0 : i32
    return %arg0, %c0_i32 : i32, i32
  }
  func.func @transform_1(%arg0: i32) -> (i32, i32) {
    %c0_i32 = arith.constant 0 : i32
    %c0_i32_0 = arith.constant 0 : i32
    %c0_i32_1 = arith.constant 0 : i32
    return %c0_i32, %c0_i32_0 : i32, i32
  }
  func.func @transform_2(%arg0: i32) -> (i32, i32) {
    %c0_i32 = arith.constant 0 : i32
    %c0_i32_0 = arith.constant 0 : i32
    %c0_i32_1 = arith.constant 0 : i32
    return %c0_i32, %c0_i32_0 : i32, i32
  }
  func.func @transform_3(%arg0: i32) -> (i32, i32) {
    %c0_i32 = arith.constant 0 : i32
    %c0_i32_0 = arith.constant 0 : i32
    return %arg0, %c0_i32 : i32, i32
  }
}

</mosaic_0001>

<bundles_post_ra>
// kernel: tpu_custom_call.1
= control target key start
LH: loop header
LB: loop body
LE: loop exit
PB: predicated region body
PF: predicated region fallthrough
CT: control target
= control target key end

     0   :  { %8 = vsyncpa [#allocation3], 0  ;;  %s441_s0 = inlined_call_operand.hbm [shape: f32[8,256], index: 0, kind: input, shape index: {}]   ;;  %s442_s1 = inlined_call_operand.hbm [shape: bf16[256,128], index: 1, kind: input, shape index: {}]   ;;  %s443_s2 = inlined_call_operand.vmem [shape: f32[1,128], index: 2, kind: input, shape index: {}]   ;;  %s444_s3 = inlined_call_operand.hbm [shape: f32[8,128], index: 3, kind: output, shape index: {}]  }
   0x1   :  { %9 = vsyncpa [#allocation6], 0 }
   0x2   :  { %10 = vsyncpa [#allocation4], 0  ;;  %s370_s12 = smov [#allocation2]   ;;  %s371_s14 = smov [#allocation5]  }
   0x3   :  { %s17_s13 = sshll.u32 %s370_s12, 4  ;;  %s26_s15 = sshll.u32 %s371_s14, 4  ;;  %s18_s13 = int_to_ptr.vmem [resolvable:$true] %s17_s13  ;;  %s395_s15 = int_to_ptr.vmem [resolvable:$true] %s26_s15 }
   0x4   :  { %s298_s18 = scalar_lea.hbm %s441_s0, 256 }
   0x5   :  { %p299_p0 = scmp.ne.s32.totalorder %s441_s0, %s298_s18  ;;  %p302_p1 = scmp.lt.u32.totalorder %s298_s18, %s441_s0 }
   0x7   :  { %p304_p2 = pnand %p302_p1, %p299_p0 }
   0x9   :  { %307 = shalt.err (!%p304_p2)
}
   0xa   :  { %s308_s23 = scalar_lea.vmem %s18_s13, 256  ;;  %p313_p4 = scmp.lt.s32.totalorder %s18_s13, %s18_s13 }
   0xb   :  { %p309_p3 = scmp.ne.s32.totalorder %s18_s13, %s308_s23  ;;  %p314_p5 = scmp.lt.s32.totalorder %s308_s23, %s308_s23 }
   0xd   :  { %p315_p6 = por %p314_p5, %p313_p4 }
   0xf   :  { %p316_p7 = pnand %p315_p6, %p309_p3 }
  0x11   :  { %319 = shalt.err (!%p316_p7)
}
  0x12   :  { %20 = dma.hbm_to_vmem [thread:$0]  %s441_s0, 256, %s18_s13, [#allocation3]  }
  0x13   :  { %s320_s28 = scalar_lea.hbm %s442_s1, 2048 }
  0x14   :  { %p321_p8 = scmp.ne.s32.totalorder %s442_s1, %s320_s28  ;;  %p324_p9 = scmp.lt.u32.totalorder %s320_s28, %s442_s1 }
  0x16   :  { %p326_p10 = pnand %p324_p9, %p321_p8 }
  0x18   :  { %329 = shalt.err (!%p326_p10)
}
  0x19   :  { %s330_s6 = scalar_lea.vmem %s395_s15, 2048  ;;  %p335_p12 = scmp.lt.s32.totalorder %s395_s15, %s395_s15 }
  0x1a   :  { %p331_p11 = scmp.ne.s32.totalorder %s395_s15, %s330_s6  ;;  %p336_p13 = scmp.lt.s32.totalorder %s330_s6, %s330_s6 }
  0x1c   :  { %p337_p0 = por %p336_p13, %p335_p12 }
  0x1e   :  { %p338_p1 = pnand %p337_p0, %p331_p11 }
  0x20   :  { %341 = shalt.err (!%p338_p1)
}
  0x21   :  { %s372_s0 = smov 64   ;;  %s373_s7 = smov 4  }
  0x22   :  { %32 = dma.hbm_to_vmem [thread:$0]  %s442_s1, 2048, %s395_s15, [#allocation6], %s372_s0, %s372_s0, %s373_s7  }
  0x23   :  { %364 = dma.done.wait [#allocation3], 256  }
  0x24   :  { %365 = vsyncadd [#allocation3], 4294967040 }
  0x25   :  { %366 = dma.done.wait [#allocation6], 2048  }
  0x26   :  { %367 = vsyncadd [#allocation6], 4294965248  ;;  %v282_v0 = vld [vmem:[#allocation5 + $0x40] sm:$0xff]   ;;  %v284_v2 = vld [vmem:[#allocation5 + $0x48] sm:$0xff]   ;;  %s374_s11 = smov [#allocation7]  }
  0x27   :  { %v283_v1 = vld [vmem:[#allocation5] sm:$0xff]   ;;  %255 = vmatprep.subr.bf16.mxu0 %v282_v0  ;;  %v285_v3 = vld [vmem:[#allocation5 + $0x8] sm:$0xff]   ;;  %v286_v4 = vld [vmem:[#allocation5 + $0x50] sm:$0xff]   ;;  %s228_s12 = sshll.u32 %s374_s11, 4  ;;  %s229_s12 = int_to_ptr.vmem [resolvable:$true] %s228_s12 }
  0x28   :  { %256 = vmatpush3.bf16.msra.mxu0 %v283_v1  ;;  %v287_v5 = vld [vmem:[#allocation5 + $0x10] sm:$0xff]   ;;  %v288_v6 = vld [vmem:[#allocation5 + $0x58] sm:$0xff]   ;;  %v290_v8 = vld [vmem:[#allocation5 + $0x60] sm:$0xff]   ;;  %s342_s13 = scalar_lea.vmem %s229_s12, 128  ;;  %p347_p3 = scmp.lt.s32.totalorder %s229_s12, %s229_s12 }
  0x29   :  { %257 = vmatprep.subr.bf16.mxu0 %v284_v2  ;;  %v289_v7 = vld [vmem:[#allocation5 + $0x18] sm:$0xff]   ;;  %v291_v9 = vld [vmem:[#allocation5 + $0x20] sm:$0xff]   ;;  %v292_v10 = vld [vmem:[#allocation5 + $0x68] sm:$0xff]   ;;  %p343_p2 = scmp.ne.s32.totalorder %s229_s12, %s342_s13  ;;  %p348_p4 = scmp.lt.s32.totalorder %s342_s13, %s342_s13 }
  0x2a   :  { %v43_v11 = vld [vmem:[#allocation2 + $0x8] sm:$0xff]  ;;  %v293_v13 = vld [vmem:[#allocation5 + $0x28] sm:$0xff]   ;;  %v294_v14 = vld [vmem:[#allocation5 + $0x70] sm:$0xff]  }
  0x2b   :  { %v45_v12 = vpack.c.bf16 %v43_v11, %v43_v11  ;;  %v295_v15 = vld [vmem:[#allocation5 + $0x30] sm:$0xff]   ;;  %v296_v16 = vld [vmem:[#allocation5 + $0x78] sm:$0xff]   ;;  %p349_p5 = por %p348_p4, %p347_p3 }
  0x2c   :  { %258 = vmatpush3.bf16.msra.mxu0 %v285_v3  ;;  %v297_v17 = vld [vmem:[#allocation5 + $0x38] sm:$0xff]   ;;  %v42_v18 = vld [vmem:[#allocation2] sm:$0xff] }
  0x2d   :  { %259 = vmatprep.subr.bf16.mxu0 %v286_v4  ;;  %213 = vmatprep.mubr.bf16.mxu0 %v45_v12  ;;  %v44_v19 = vpack.c.bf16 %v42_v18, %v42_v18  ;;  %v238_v21 = vld [vmem:[%s443_s2] ss:$0 sm:$0xff]  ;;  %p350_p6 = pnand %p349_p5, %p343_p2 }
  0x30   :  { %260 = vmatpush3.bf16.msra.mxu0 %v287_v5 }
  0x31   :  { %261 = vmatprep.subr.bf16.mxu0 %v288_v6 }
  0x34   :  { %262 = vmatpush3.bf16.msra.mxu0 %v289_v7 }
  0x35   :  { %263 = vmatprep.subr.bf16.mxu0 %v290_v8 }
  0x38   :  { %264 = vmatpush3.bf16.msra.mxu0 %v291_v9 }
  0x39   :  { %265 = vmatprep.subr.bf16.mxu0 %v292_v10 }
  0x3c   :  { %266 = vmatpush3.bf16.msra.mxu0 %v293_v13 }
  0x3d   :  { %267 = vmatprep.subr.bf16.mxu0 %v294_v14 }
  0x40   :  { %268 = vmatpush3.bf16.msra.mxu0 %v295_v15 }
  0x41   :  { %269 = vmatprep.subr.bf16.mxu0 %v296_v16 }
  0x44   :  { %270 = vmatpush3.bf16.msra.mxu0 %v297_v17 }
  0x47   :  { %214 = vmatmul.mubr.bf16.vlgmr.msra.gmra.mrb[0].mxu0 %v44_v19 }
 0x11a   :  { %v271_v20 = vpop.f32.mrb[0].mxu0 }
 0x11b   :  { %v272_v22 = vpop.f32.mrb[1].mxu0 }
 0x11c   :  { %v273_v23 = vadd.f32 %v272_v22, %v271_v20  ;;  %v274_v24 = vpop.f32.mrb[2].mxu0 }
 0x11d   :  { %v275_v25 = vpop.f32.mrb[3].mxu0 }
 0x11e   :  { %v216_v26 = vadd.f32 %v273_v23, %v238_v21 }
 0x120   :  { %221 = vst [vmem:[#allocation7] sm:$0xff] %v216_v26 }
 0x121   :  { %353 = shalt.err (!%p350_p6)
}
 0x122   :  { %s354_s2 = scalar_lea.hbm %s444_s3, 128 }
 0x123   :  { %p355_p7 = scmp.ne.s32.totalorder %s444_s3, %s354_s2  ;;  %p358_p8 = scmp.lt.u32.totalorder %s354_s2, %s444_s3 }
 0x125   :  { %p360_p9 = pnand %p358_p8, %p355_p7 }
 0x127   :  { %363 = shalt.err (!%p360_p9)
}
 0x128   :  { %231 = dma.vmem_to_hbm [thread:$0]  %s229_s12, 128, %s444_s3, [#allocation4]  }
 0x129   :  { %368 = dma.done.wait [#allocation4], 128  }
 0x12a   :  { %369 = vsyncadd [#allocation4], 4294967168 }
 0x12b   :  { %235 = vsyncpa [#allocation3], 1 }
 0x12c   :  { %236 = vsyncpa [#allocation6], 1 }
 0x12d   :  { %237 = vsyncpa [#allocation4], 1 }

</bundles_post_ra>
